<compile_context>
chip_gen: v7x
topology: tpu7x:2x2x1
jax: 0.10.0
libtpu: 0.0.40
codegen_flags: <defaults>
</compile_context>

<pallas_src>
import jax
import jax.numpy as jnp
from jax.experimental import pallas as pl
from jax.experimental.pallas import tpu as pltpu

_OUTP = 8     # padded output lane width (== full last dim of the output array)
_NEG = -1e30  # padding-lane bias: exp(_NEG - m) underflows to 0, so log_softmax
              # over the 8-wide slab equals log_softmax over the 2 real logits.


def _dummy_model_kernel(x_ref, w0_ref, b0_ref, w1_ref, b1_ref, o_ref):
    """One batch tile of the whole forward pass.

    x_ref : (TB, 20)   float32 flattened input tile
    w0_ref: (20, 20)   block-diagonal lin0 weight (in, out)
    b0_ref: (1, 20)    lin0 bias tiled over the 4 groups
    w1_ref: (20, 8)    lin1 weight (in, out), zero-padded to 8 lanes
    b1_ref: (1, 8)     lin1 bias, padded lanes set to a large negative value
    o_ref : (TB, 8)    log-softmax output slab (real result in lanes [:2])
    """
    x = x_ref[...]  # already f32 (mirrors X.float(), cast applied in wrapper)

    # lin0 (block-diagonal) + ReLU
    h = jnp.maximum(
        jnp.dot(x, w0_ref[...], preferred_element_type=jnp.float32) + b0_ref[...],
        0.0)

    # lin1 into an 8-wide slab of logits (padding lanes are exactly -1e30)
    z = jnp.dot(h, w1_ref[...], preferred_element_type=jnp.float32) + b1_ref[...]

    # fused log_softmax epilogue (padding lanes contribute exp(...) == 0)
    m = jnp.max(z, axis=-1, keepdims=True)
    lse = jnp.log(jnp.sum(jnp.exp(z - m), axis=-1, keepdims=True))
    o_ref[...] = z - m - lse


def _round_up(v, m):
    return ((v + m - 1) // m) * m


def dummy_model_forward(x, w0, b0, w1, b1, *, max_block_rows=1024):
    """x: (B, G, 5); w0: (5,5) torch layout (out,in); b0: (5,);
    w1: (2,20) torch layout (out,in); b1: (2,).  Returns (B, 2) float32."""
    B, G, F = x.shape
    IN = G * F                     # 20 flattened features feeding lin1
    OUT = w1.shape[0]              # 2 classes

    # ---- host-side weight prep (layout plumbing kept out of the kernel) ----
    w0_t = jnp.asarray(w0, jnp.float32).T                          # (5, 5)  (in, out)
    w0_bd = jnp.kron(jnp.eye(G, dtype=jnp.float32), w0_t)          # (20, 20) block-diag
    b0_t = jnp.tile(jnp.asarray(b0, jnp.float32), (G,)).reshape(1, IN)  # (1, 20)

    w1_t = jnp.asarray(w1, jnp.float32).T                          # (20, 2)
    w1_p = jnp.zeros((IN, _OUTP), jnp.float32).at[:, :OUT].set(w1_t)
    b1_p = jnp.full((1, _OUTP), _NEG, jnp.float32).at[0, :OUT].set(
        jnp.asarray(b1, jnp.float32))

    # ---- input: X.float() + row-major flatten (no host-side padding) ----
    x_flat = jnp.asarray(x).reshape(B, IN).astype(jnp.float32)     # (B, 20)

    # Batch tile: sublane-aligned, capped, and small enough that mid-size
    # batches still get several grid steps (megacore sharding on v7x).
    TB = max(8, min(max_block_rows, _round_up(pl.cdiv(B, 8), 8)))
    grid = (pl.cdiv(B, TB),)       # ragged last block handled by Pallas

    grid_spec = pltpu.PrefetchScalarGridSpec(
        num_scalar_prefetch=0,
        grid=grid,
        in_specs=[
            pl.BlockSpec((TB, IN), lambda i: (i, 0)),
            pl.BlockSpec((IN, IN), lambda i: (0, 0)),
            pl.BlockSpec((1, IN), lambda i: (0, 0)),
            pl.BlockSpec((IN, _OUTP), lambda i: (0, 0)),
            pl.BlockSpec((1, _OUTP), lambda i: (0, 0)),
        ],
        out_specs=pl.BlockSpec((TB, _OUTP), lambda i: (i, 0)),
    )

    out = pl.pallas_call(
        _dummy_model_kernel,
        out_shape=jax.ShapeDtypeStruct((B, _OUTP), jnp.float32),
        grid_spec=grid_spec,
        compiler_params=pltpu.CompilerParams(
            dimension_semantics=("parallel",)),
    )(x_flat, w0_bd, b0_t, w1_p, b1_p)

    return out[:, :OUT]


def _torch_linear_init(key, out_features, in_features):
    """Deterministic stand-in for torch.nn.Linear default init."""
    kw, kb = jax.random.split(key)
    bound = 1.0 / jnp.sqrt(jnp.float32(in_features))
    w = jax.random.uniform(kw, (out_features, in_features), jnp.float32,
                           minval=-bound, maxval=bound)
    b = jax.random.uniform(kb, (out_features,), jnp.float32,
                           minval=-bound, maxval=bound)
    return w, b


if __name__ == "__main__":
    key = jax.random.PRNGKey(0)
    k_x, k_l0, k_l1 = jax.random.split(key, 3)

    # Small shapes consistent with the module: trailing feature dim 5 for lin0,
    # and 4*5 = 20 flattened features feeding lin1.
    B, G, F = 2, 4, 5
    x = jax.random.normal(k_x, (B, G, F), jnp.float32)

    w0, b0 = _torch_linear_init(k_l0, 5, 5)     # lin0: Linear(5, 5)
    w1, b1 = _torch_linear_init(k_l1, 2, 20)    # lin1: Linear(20, 2)

    out = dummy_model_forward(x, w0, b0, w1, b1)
    out = jax.block_until_ready(out)

    # Pure-JAX reference of the same semantics.
    h_ref = jnp.maximum(jnp.einsum("bgi,oi->bgo", x, w0) + b0, 0.0)
    z_ref = h_ref.reshape(B, G * F) @ w1.T + b1
    ref = jax.nn.log_softmax(z_ref, axis=-1)

    assert out.shape == (B, 2) and out.dtype == jnp.float32
    assert jnp.allclose(out, ref, atol=1e-5, rtol=1e-5)

    print("KERNEL_OK")
</pallas_src>

<mosaic_0001>
module attributes {stable_mosaic.version = 11 : i64} {
  func.func @_dummy_model_kernel(%arg0: i32, %arg1: memref<8x20xf32, #tpu.memory_space<vmem>>, %arg2: memref<20x20xf32, #tpu.memory_space<vmem>>, %arg3: memref<1x20xf32, #tpu.memory_space<vmem>>, %arg4: memref<20x8xf32, #tpu.memory_space<vmem>>, %arg5: memref<1x8xf32, #tpu.memory_space<vmem>>, %arg6: memref<8x8xf32, #tpu.memory_space<vmem>>) attributes {dimension_semantics = [#tpu.dimension_semantics<parallel>], iteration_bounds = array<i64: 1>, scalar_prefetch = 0 : i64, scratch_operands = 0 : i64, tpu.core_type = #tpu.core_type<tc>, window_params = [{transform_indices = @transform_0, window_bounds = array<i64: 8, 20>}, {pipeline_mode = #tpu.pipeline_mode<synchronous>, transform_indices = @transform_1, window_bounds = array<i64: 20, 20>}, {pipeline_mode = #tpu.pipeline_mode<synchronous>, transform_indices = @transform_2, window_bounds = array<i64: 1, 20>}, {pipeline_mode = #tpu.pipeline_mode<synchronous>, transform_indices = @transform_3, window_bounds = array<i64: 20, 8>}, {pipeline_mode = #tpu.pipeline_mode<synchronous>, transform_indices = @transform_4, window_bounds = array<i64: 1, 8>}, {transform_indices = @transform_5, window_bounds = array<i64: 8, 8>}]} {
    %c0 = arith.constant 0 : index
    %c0_0 = arith.constant 0 : index
    %0 = vector.load %arg1[%c0, %c0_0] : memref<8x20xf32, #tpu.memory_space<vmem>>, vector<8x20xf32>
    %c0_1 = arith.constant 0 : index
    %c0_2 = arith.constant 0 : index
    %1 = vector.load %arg2[%c0_1, %c0_2] : memref<20x20xf32, #tpu.memory_space<vmem>>, vector<20x20xf32>
    %cst = arith.constant dense<0.000000e+00> : vector<8x20xf32>
    %2 = tpu.matmul %0, %1, %cst {dimension_numbers = #tpu.dot_dimension_numbers<[1], [0], [0], [1], [0, 0, 1, 1], [], []>} : vector<8x20xf32>, vector<20x20xf32>, vector<8x20xf32> -> vector<8x20xf32>
    %c0_3 = arith.constant 0 : index
    %c0_4 = arith.constant 0 : index
    %3 = vector.load %arg3[%c0_3, %c0_4] : memref<1x20xf32, #tpu.memory_space<vmem>>, vector<1x20xf32>
    %4 = vector.broadcast %3 : vector<1x20xf32> to vector<8x20xf32>
    %5 = arith.addf %2, %4 : vector<8x20xf32>
    %cst_5 = arith.constant 0.000000e+00 : f32
    %6 = vector.broadcast %cst_5 : f32 to vector<8x20xf32>
    %7 = arith.maximumf %5, %6 : vector<8x20xf32>
    %c0_6 = arith.constant 0 : index
    %c0_7 = arith.constant 0 : index
    %8 = vector.load %arg4[%c0_6, %c0_7] : memref<20x8xf32, #tpu.memory_space<vmem>>, vector<20x8xf32>
    %cst_8 = arith.constant dense<0.000000e+00> : vector<8x8xf32>
    %9 = tpu.matmul %7, %8, %cst_8 {dimension_numbers = #tpu.dot_dimension_numbers<[1], [0], [0], [1], [0, 0, 1, 1], [], []>} : vector<8x20xf32>, vector<20x8xf32>, vector<8x8xf32> -> vector<8x8xf32>
    %c0_9 = arith.constant 0 : index
    %c0_10 = arith.constant 0 : index
    %10 = vector.load %arg5[%c0_9, %c0_10] : memref<1x8xf32, #tpu.memory_space<vmem>>, vector<1x8xf32>
    %11 = vector.broadcast %10 : vector<1x8xf32> to vector<8x8xf32>
    %12 = arith.addf %9, %11 : vector<8x8xf32>
    %cst_11 = arith.constant dense<0xFF800000> : vector<8xf32>
    %13 = vector.multi_reduction <maximumf>, %12, %cst_11 [1] : vector<8x8xf32> to vector<8xf32>
    %14 = vector.shape_cast %13 : vector<8xf32> to vector<8x1xf32>
    %15 = vector.broadcast %14 : vector<8x1xf32> to vector<8x8xf32>
    %16 = arith.subf %12, %15 : vector<8x8xf32>
    %17 = math.exp %16 : vector<8x8xf32>
    %cst_12 = arith.constant dense<0.000000e+00> : vector<8xf32>
    %18 = vector.multi_reduction <add>, %17, %cst_12 [1] : vector<8x8xf32> to vector<8xf32>
    %19 = vector.shape_cast %18 : vector<8xf32> to vector<8x1xf32>
    %20 = math.log %19 : vector<8x1xf32>
    %21 = vector.broadcast %14 : vector<8x1xf32> to vector<8x8xf32>
    %22 = arith.subf %12, %21 : vector<8x8xf32>
    %23 = vector.broadcast %20 : vector<8x1xf32> to vector<8x8xf32>
    %24 = arith.subf %22, %23 : vector<8x8xf32>
    %c0_13 = arith.constant 0 : index
    %c0_14 = arith.constant 0 : index
    %25 = vector.load %arg6[%c0_13, %c0_14] : memref<8x8xf32, #tpu.memory_space<vmem>>, vector<8x8xf32>
    tpu.vector_store %arg6[%c0_13, %c0_14], %24 {strides = array<i32>} : memref<8x8xf32, #tpu.memory_space<vmem>>, vector<8x8xf32>,
    return
  }
  func.func @transform_0(%arg0: i32) -> (i32, i32) {
    %c0_i32 = arith.constant 0 : i32
    %c0_i32_0 = arith.constant 0 : i32
    return %arg0, %c0_i32 : i32, i32
  }
  func.func @transform_1(%arg0: i32) -> (i32, i32) {
    %c0_i32 = arith.constant 0 : i32
    %c0_i32_0 = arith.constant 0 : i32
    %c0_i32_1 = arith.constant 0 : i32
    return %c0_i32, %c0_i32_0 : i32, i32
  }
  func.func @transform_2(%arg0: i32) -> (i32, i32) {
    %c0_i32 = arith.constant 0 : i32
    %c0_i32_0 = arith.constant 0 : i32
    %c0_i32_1 = arith.constant 0 : i32
    return %c0_i32, %c0_i32_0 : i32, i32
  }
  func.func @transform_3(%arg0: i32) -> (i32, i32) {
    %c0_i32 = arith.constant 0 : i32
    %c0_i32_0 = arith.constant 0 : i32
    %c0_i32_1 = arith.constant 0 : i32
    return %c0_i32, %c0_i32_0 : i32, i32
  }
  func.func @transform_4(%arg0: i32) -> (i32, i32) {
    %c0_i32 = arith.constant 0 : i32
    %c0_i32_0 = arith.constant 0 : i32
    %c0_i32_1 = arith.constant 0 : i32
    return %c0_i32, %c0_i32_0 : i32, i32
  }
  func.func @transform_5(%arg0: i32) -> (i32, i32) {
    %c0_i32 = arith.constant 0 : i32
    %c0_i32_0 = arith.constant 0 : i32
    return %arg0, %c0_i32 : i32, i32
  }
}

</mosaic_0001>

<bundles_post_ra>
// kernel: tpu_custom_call.1
= control target key start
LH: loop header
LB: loop body
LE: loop exit
PB: predicated region body
PF: predicated region fallthrough
CT: control target
= control target key end

     0   :  { %10 = vsyncpa [#allocation3], 0  ;;  %v299_v2 = vmov 0.0|0.0   ;;  %vm300_vm0 = vmmov 0   ;;  %v301_v4 = vmov 0.0   ;;  %vm36_vm1 = vcmask 1043456   ;;  %s377_s0 = inlined_call_operand.vmem [shape: f32[2,20], index: 0, kind: input, shape index: {}]   ;;  %s378_s1 = inlined_call_operand.vmem [shape: f32[20,20], index: 1, kind: input, shape index: {}]   ;;  %s379_s2 = inlined_call_operand.vmem [shape: f32[1,20], index: 2, kind: input, shape index: {}]   ;;  %s380_s3 = inlined_call_operand.vmem [shape: f32[20,8], index: 3, kind: input, shape index: {}]   ;;  %s381_s4 = inlined_call_operand.vmem [shape: f32[1,8], index: 4, kind: input, shape index: {}]   ;;  %s382_s5 = inlined_call_operand.hbm [shape: f32[2,8], index: 5, kind: output, shape index: {}]  }
   0x1   :  { %v22_v0 = vld [vmem:[%s378_s1] sm:$0xff]  ;;  %v23_v1 = vld [vmem:[%s378_s1 + $0x8] sm:$0xff]  ;;  %259 = vmatprep.subr.bf16.mxu0 %v299_v2  ;;  %262 = vmatprep.subr.bf16.mxu1 %v299_v2  ;;  %v24_v5 = vld [vmem:[%s378_s1 + $0x10] sm:$0xf]  ;;  %vm32_vm2 = vcmask 162816   ;;  %vm197_vm3 = vcmask 64512  }
   0x2   :  { %v260_v3 = vpack.c.bf16 %v23_v1, %v22_v0  ;;  %247 = vmatprep.mubr.msk.f32.mxu0 %vm300_vm0, %v301_v4  ;;  %256 = vmatprep.mubr.msk.f32.mxu1 %vm300_vm0, %v301_v4  ;;  %v21_v6 = vld [vmem:[%s377_s0] sm:$0xff]  ;;  %v112_v8 = vld [vmem:[%s380_s3 + $0x8] sm:$0xff]  ;;  %v113_v10 = vld [vmem:[%s380_s3 + $0x10] sm:$0xf] }
   0x3   :  { %v111_v7 = vld [vmem:[%s380_s3] sm:$0xff] }
   0x4   :  { %261 = vmatpush3.bf16.msra.mxu0 %v260_v3  ;;  %v263_v9 = vpack.c.bf16 %v112_v8, %v111_v7  ;;  %v227_v11 = vld [vmem:[%s379_s2] ss:$0 sm:$0xff] }
   0x5   :  { %245 = vmatprep.subr.mxu0 %v301_v4  ;;  %v230_v16 = vld [vmem:[%s381_s4] ss:$0 sm:$0xff] }
   0x6   :  { %264 = vmatpush3.bf16.msra.mxu1 %v263_v9 }
   0x7   :  { %254 = vmatprep.subr.mxu1 %v301_v4 }
   0x8   :  { %246 = vmatpush3.msk.msra.mxu0 %vm36_vm1, %v24_v5 }
   0x9   :  { %248 = vmatmul.mubr.msk.f32.vlgmr.msra.gmra.mrb[0].mxu0 %vm32_vm2, %v21_v6 }
   0xa   :  { %255 = vmatpush3.msk.msra.mxu1 %vm36_vm1, %v113_v10 }
  0xdc   :  { %v106_v12 = vpop.f32.mrb[0].mxu0 }
  0xdd   :  { %v107_v13 = vadd.f32 %v227_v11, %v106_v12  ;;  %v249_v14 = vpop.f32.mrb[1].mxu0 }
  0xdf   :  { %v110_v15 = vmax.f32 %v107_v13, 0.0 }
  0xe1   :  { %257 = vmatmul.mubr.msk.f32.vlgmr.msra.gmra.mrb[0].mxu1 %vm32_vm2, %v110_v15 }
 0x1b4   :  { %v193_v17 = vpop.f32.mrb[0].mxu1 }
 0x1b5   :  { %v194_v18 = vadd.f32 %v230_v16, %v193_v17  ;;  %v258_v19 = vpop.f32.mrb[1].mxu1 }
 0x1b7   :  { %v198_v20 = vsel %vm197_vm3, %v194_v18, -inf }
 0x1b8   :  { %199 = vmax.xlane.f32.xlu0 %v198_v20 }
 0x245   :  { %v200_v21 = vpop.xlane.xlu0 %199 }
 0x246   :  { %v201_v22 = vsub.f32 %v194_v18, %v200_v21 }
 0x248   :  { %v202_v23 = vmul.f32 1.442695, %v201_v22 }
 0x24a   :  { %271 = vpow2.f32 %v202_v23 }
 0x254   :  { %v272_v24 = vpop.eup %271 }
 0x255   :  { %v204_v25 = vsel %vm197_vm3, %v272_v24, 0.0 }
 0x256   :  { %205 = vadd.xlane.f32.xlu0 %v204_v25 }
 0x2e3   :  { %v206_v26 = vpop.xlane.xlu0 %205 }
 0x2e4   :  { %273 = vlog2.f32 %v206_v26 }
 0x2ee   :  { %v274_v27 = vpop.eup %273 }
 0x2ef   :  { %v208_v28 = vmul.f32 0.6931472, %v274_v27 }
 0x2f1   :  { %v209_v29 = vsub.f32 %v201_v22, %v208_v28 }
 0x2f3   :  { %210 = vst.msk [vmem:[#allocation2] sm:$0xff] %vm197_vm3, %v209_v29 }
 0x2f4   :  { %215 = vsyncadd [#allocation3], 96  ;;  %s302_s2 = smov [#allocation2]  }
 0x2f5   :  { %s216_s3 = sshll.u32 %s302_s2, 4  ;;  %s217_s3 = int_to_ptr.vmem [resolvable:$true] %s216_s3 }
 0x2f6   :  { %s275_s4 = scalar_lea.vmem %s217_s3, 32  ;;  %s279_s9 = scalar_lea.vmem %s217_s3, 128 }
 0x2f7   :  { %p276_p0 = scmp.ne.s32.totalorder %s217_s3, %s275_s4  ;;  %p280_p1 = scmp.lt.s32.totalorder %s217_s3, %s217_s3 }
 0x2f8   :  { %p281_p2 = scmp.lt.s32.totalorder %s279_s9, %s275_s4 }
 0x2fa   :  { %p282_p3 = por %p281_p2, %p280_p1 }
 0x2fc   :  { %p283_p4 = pnand %p282_p3, %p276_p0 }
 0x2fe   :  { %286 = shalt.err (!%p283_p4)
}
 0x2ff   :  { %s287_s12 = scalar_lea.hbm %s382_s5, 32 }
 0x300   :  { %p288_p5 = scmp.ne.s32.totalorder %s382_s5, %s287_s12  ;;  %p291_p6 = scmp.lt.u32.totalorder %s287_s12, %s382_s5 }
 0x302   :  { %p293_p7 = pnand %p291_p6, %p288_p5 }
 0x304   :  { %296 = shalt.err (!%p293_p7)
}
 0x305   :  { %s303_s17 = smov 32   ;;  %s304_s18 = smov 2  }
 0x306   :  { %222 = dma.vmem_to_hbm [thread:$0]  %s217_s3, 32, %s382_s5, [#allocation3], %s303_s17, %s303_s17, %s304_s18  }
 0x307   :  { %297 = dma.done.wait [#allocation3], 128  }
 0x308   :  { %298 = vsyncadd [#allocation3], 4294967168 }
 0x309   :  { %226 = vsyncpa [#allocation3], 1 }

</bundles_post_ra>
